<compile_context>
chip_gen: v6e
topology: v6e:2x2x1
jax: 0.10.0
libtpu: 0.0.40
codegen_flags: <defaults>
</compile_context>

<pallas_src>
import jax
import jax.numpy as jnp
from jax.experimental import pallas as pl
from jax.experimental.pallas import tpu as pltpu


# --------------------------------------------------------------------------- #
# Helpers
# --------------------------------------------------------------------------- #
def _round_up(n: int, m: int) -> int:
    return ((n + m - 1) // m) * m


def _pick_tile(total: int, target: int) -> int:
    """Largest multiple of 128 that divides `total` and is <= target."""
    t = min(target, total)
    while total % t:
        t -= 128
    return t


def _vmem_limit_bytes(in_block_bytes, out_block_bytes, scratch_bytes=0) -> int:
    """Derive a per-generation-safe VMEM limit from actual block footprints."""
    need = 2 * sum(in_block_bytes) + 2 * sum(out_block_bytes) + scratch_bytes
    # 2x margin for compiler-internal scratch; floor 16 MiB (safe everywhere),
    # cap 56 MiB (fits v7x's 64 MiB physical VMEM).
    return int(min(max(2 * need, 16 * 1024 * 1024), 56 * 1024 * 1024))


# --------------------------------------------------------------------------- #
# Kernels
# --------------------------------------------------------------------------- #
def hidden_kernel(x_ref, w1t_ref, b1_ref, h_ref, acc_ref):
    """h = x @ W1^T + b1, with the vocab contraction tiled over the grid.

    x_ref:   (B, tk)  bf16     -- tile k of the input along the vocab axis
    w1t_ref: (tk, Fp) bf16     -- matching tile of pre-transposed W1
    b1_ref:  (1, Fp)  f32
    h_ref:   (B, Fp)  bf16 out -- resident across the reduction axis
    acc_ref: (B, Fp)  f32 VMEM scratch accumulator
    """
    k = pl.program_id(0)

    @pl.when(k == 0)
    def _():
        acc_ref[...] = jnp.zeros_like(acc_ref)

    acc_ref[...] += jnp.dot(
        x_ref[...], w1t_ref[...], preferred_element_type=jnp.float32
    )

    @pl.when(k == pl.num_programs(0) - 1)
    def _():
        h_ref[...] = (acc_ref[...] + b1_ref[...]).astype(h_ref.dtype)


def output_softmax_kernel(h_ref, w2t_ref, b2_ref, out_ref):
    """One tv-wide output-vocab tile: logits = h @ W2^T + b2, softmax over batch.

    h_ref:   (B, Fp)  bf16     -- full hidden activations (constant across tiles)
    w2t_ref: (Fp, tv) bf16     -- column tile of pre-transposed W2
    b2_ref:  (1, tv)  f32
    out_ref: (B, tv)  f32
    """
    logits = jnp.dot(
        h_ref[...], w2t_ref[...], preferred_element_type=jnp.float32
    ) + b2_ref[...]

    # Softmax over axis 0 (batch) -- per-column, so independent across V tiles.
    # Entirely f32 (v5e-safe); reciprocal goes to the EUP slot.
    m = jnp.max(logits, axis=0, keepdims=True)
    e = jnp.exp(logits - m)
    denom = jnp.sum(e, axis=0, keepdims=True)
    out_ref[...] = (e * pl.reciprocal(denom, approx=True)).astype(out_ref.dtype)


# --------------------------------------------------------------------------- #
# pallas_call wrappers
# --------------------------------------------------------------------------- #
def _hidden_call(xp, w1t, b1p, *, tk):
    B, Vp = xp.shape
    Fp = w1t.shape[1]
    nk = Vp // tk

    cost = pl.CostEstimate(
        flops=2 * B * Vp * Fp,
        transcendentals=0,
        bytes_accessed=2 * B * Vp + 2 * Vp * Fp + 4 * Fp + 2 * B * Fp,
    )
    vmem = _vmem_limit_bytes(
        in_block_bytes=[B * tk * 2, tk * Fp * 2, Fp * 4],
        out_block_bytes=[B * Fp * 2],
        scratch_bytes=B * Fp * 4,
    )

    return pl.pallas_call(
        hidden_kernel,
        out_shape=jax.ShapeDtypeStruct((B, Fp), jnp.bfloat16),
        grid_spec=pltpu.PrefetchScalarGridSpec(
            num_scalar_prefetch=0,
            grid=(nk,),
            in_specs=[
                pl.BlockSpec((B, tk), lambda k: (0, k)),    # x tile
                pl.BlockSpec((tk, Fp), lambda k: (k, 0)),   # W1^T tile
                pl.BlockSpec((1, Fp), lambda k: (0, 0)),    # b1 (constant)
            ],
            out_specs=pl.BlockSpec((B, Fp), lambda k: (0, 0)),
            scratch_shapes=[pltpu.VMEM((B, Fp), jnp.float32)],
        ),
        compiler_params=pltpu.CompilerParams(
            dimension_semantics=("arbitrary",),   # reduction axis
            vmem_limit_bytes=vmem,
        ),
        cost_estimate=cost,
    )(xp, w1t, b1p)


def _output_softmax_call(h, w2t, b2p, *, tv):
    B, Fp = h.shape
    Vp = w2t.shape[1]
    nv = Vp // tv

    cost = pl.CostEstimate(
        flops=2 * B * Fp * Vp,
        transcendentals=B * Vp,
        bytes_accessed=2 * B * Fp + 2 * Fp * Vp + 4 * Vp + 4 * B * Vp,
    )
    vmem = _vmem_limit_bytes(
        in_block_bytes=[B * Fp * 2, Fp * tv * 2, tv * 4],
        out_block_bytes=[B * tv * 4],
    )

    return pl.pallas_call(
        output_softmax_kernel,
        out_shape=jax.ShapeDtypeStruct((B, Vp), jnp.float32),
        grid_spec=pltpu.PrefetchScalarGridSpec(
            num_scalar_prefetch=0,
            grid=(nv,),
            in_specs=[
                pl.BlockSpec((B, Fp), lambda j: (0, 0)),    # h (constant)
                pl.BlockSpec((Fp, tv), lambda j: (0, j)),   # W2^T column tile
                pl.BlockSpec((1, tv), lambda j: (0, j)),    # b2 tile
            ],
            out_specs=pl.BlockSpec((B, tv), lambda j: (0, j)),
        ),
        compiler_params=pltpu.CompilerParams(
            dimension_semantics=("parallel",),
            vmem_limit_bytes=vmem,
        ),
        cost_estimate=cost,
    )(h, w2t, b2p)


def make_net_forward(w1, b1, w2, b2, *, tk_target=512, tv_target=256):
    """Pad / transpose / bf16-cast the weights ONCE; return a jitted forward(x).

    w1: (F, V), b1: (F,), w2: (V, F), b2: (V,)  -- PyTorch nn.Linear layouts.
    Per call, only x is padded (lane dims to multiples of 128) and cast.
    The batch axis B is never padded (the softmax reduction runs over it).
    """
    Fdim, V = w1.shape
    Vp = _round_up(V, 128)
    Fp = _round_up(Fdim, 128)

    # One-time weight prep (zero-pad, transpose for clean MXU contraction, bf16).
    w1t = jnp.pad(w1, ((0, Fp - Fdim), (0, Vp - V))).T.astype(jnp.bfloat16)  # (Vp, Fp)
    w2t = jnp.pad(w2, ((0, Vp - V), (0, Fp - Fdim))).T.astype(jnp.bfloat16)  # (Fp, Vp)
    b1p = jnp.pad(b1, ((0, Fp - Fdim),)).reshape(1, Fp).astype(jnp.float32)
    b2p = jnp.pad(b2, ((0, Vp - V),)).reshape(1, Vp).astype(jnp.float32)

    tk = _pick_tile(Vp, tk_target)   # contraction tile for stage 1
    tv = _pick_tile(Vp, tv_target)   # output-vocab tile for stage 2 (128 matches v5e MXU)

    def _fwd(x, w1t_, b1_, w2t_, b2_):
        xp = jnp.pad(x, ((0, 0), (0, Vp - V))).astype(jnp.bfloat16)
        h = _hidden_call(xp, w1t_, b1_, tk=tk)            # computed exactly once
        out_p = _output_softmax_call(h, w2t_, b2_, tv=tv)
        return out_p[:, :V]

    fwd = jax.jit(_fwd)

    def forward(x):
        return fwd(x, w1t, b1p, w2t, b2p)

    return forward


# --------------------------------------------------------------------------- #
# Self-test
# --------------------------------------------------------------------------- #
if __name__ == "__main__":
    # Small, forward-consistent shapes: batch=8, vocab_size=32, num_features=16
    B, V, Fdim = 8, 32, 16
    key = jax.random.PRNGKey(0)
    kx, kw1, kb1, kw2, kb2 = jax.random.split(key, 5)

    x = jax.random.normal(kx, (B, V), dtype=jnp.float32)
    # Deterministic synthetic parameters (PyTorch Linear shapes: (out, in) + (out,))
    w1 = jax.random.normal(kw1, (Fdim, V), dtype=jnp.float32) * 0.1
    b1 = jax.random.normal(kb1, (Fdim,), dtype=jnp.float32) * 0.1
    w2 = jax.random.normal(kw2, (V, Fdim), dtype=jnp.float32) * 0.1
    b2 = jax.random.normal(kb2, (V,), dtype=jnp.float32) * 0.1

    forward = make_net_forward(w1, b1, w2, b2)
    out = forward(x)
    jax.block_until_ready(out)

    # Reference in plain JAX mirroring the kernel's mixed precision
    # (bf16 MXU operands, f32 accumulation, f32 softmax over the batch axis).
    h_ref = jnp.dot(x.astype(jnp.bfloat16), w1.astype(jnp.bfloat16).T,
                    preferred_element_type=jnp.float32) + b1
    logits_ref = jnp.dot(h_ref.astype(jnp.bfloat16), w2.astype(jnp.bfloat16).T,
                         preferred_element_type=jnp.float32) + b2
    ref = jax.nn.softmax(logits_ref, axis=0)

    assert out.shape == (B, V)
    err = float(jnp.max(jnp.abs(out - ref)))
    assert jnp.allclose(out, ref, atol=2e-3, rtol=2e-3), f"max abs err = {err}"

    print("KERNEL_OK")
</pallas_src>

<mosaic_0001>
module attributes {stable_mosaic.version = 11 : i64} {
  func.func @output_softmax_kernel(%arg0: i32, %arg1: memref<8x128xbf16, #tpu.memory_space<vmem>>, %arg2: memref<128x128xbf16, #tpu.memory_space<vmem>>, %arg3: memref<1x128xf32, #tpu.memory_space<vmem>>, %arg4: memref<8x128xf32, #tpu.memory_space<vmem>>) attributes {dimension_semantics = [#tpu.dimension_semantics<parallel>], iteration_bounds = array<i64: 1>, scalar_prefetch = 0 : i64, scratch_operands = 0 : i64, tpu.core_type = #tpu.core_type<tc>, window_params = [{pipeline_mode = #tpu.pipeline_mode<synchronous>, transform_indices = @transform_0, window_bounds = array<i64: 8, 128>}, {transform_indices = @transform_1, window_bounds = array<i64: 128, 128>}, {transform_indices = @transform_2, window_bounds = array<i64: 1, 128>}, {transform_indices = @transform_3, window_bounds = array<i64: 8, 128>}]} {
    %c0 = arith.constant 0 : index
    %c0_0 = arith.constant 0 : index
    %0 = vector.load %arg1[%c0, %c0_0] : memref<8x128xbf16, #tpu.memory_space<vmem>>, vector<8x128xbf16>
    %c0_1 = arith.constant 0 : index
    %c0_2 = arith.constant 0 : index
    %1 = vector.load %arg2[%c0_1, %c0_2] : memref<128x128xbf16, #tpu.memory_space<vmem>>, vector<128x128xbf16>
    %cst = arith.constant dense<0.000000e+00> : vector<8x128xf32>
    %2 = tpu.matmul %0, %1, %cst {dimension_numbers = #tpu.dot_dimension_numbers<[1], [0], [0], [1], [0, 0, 1, 1], [], []>} : vector<8x128xbf16>, vector<128x128xbf16>, vector<8x128xf32> -> vector<8x128xf32>
    %c0_3 = arith.constant 0 : index
    %c0_4 = arith.constant 0 : index
    %3 = vector.load %arg3[%c0_3, %c0_4] : memref<1x128xf32, #tpu.memory_space<vmem>>, vector<1x128xf32>
    %4 = vector.broadcast %3 : vector<1x128xf32> to vector<8x128xf32>
    %5 = arith.addf %2, %4 : vector<8x128xf32>
    %cst_5 = arith.constant dense<0xFF800000> : vector<128xf32>
    %6 = vector.multi_reduction <maximumf>, %5, %cst_5 [0] : vector<8x128xf32> to vector<128xf32>
    %7 = vector.shape_cast %6 : vector<128xf32> to vector<1x128xf32>
    %8 = vector.broadcast %7 : vector<1x128xf32> to vector<8x128xf32>
    %9 = arith.subf %5, %8 : vector<8x128xf32>
    %10 = math.exp %9 : vector<8x128xf32>
    %cst_6 = arith.constant dense<0.000000e+00> : vector<128xf32>
    %11 = vector.multi_reduction <add>, %10, %cst_6 [0] : vector<8x128xf32> to vector<128xf32>
    %12 = vector.shape_cast %11 : vector<128xf32> to vector<1x128xf32>
    %13 = tpu.reciprocal %12 {approx = true} : vector<1x128xf32> -> vector<1x128xf32>
    %14 = vector.broadcast %13 : vector<1x128xf32> to vector<8x128xf32>
    %15 = arith.mulf %10, %14 : vector<8x128xf32>
    %c0_7 = arith.constant 0 : index
    %c0_8 = arith.constant 0 : index
    %16 = vector.load %arg4[%c0_7, %c0_8] : memref<8x128xf32, #tpu.memory_space<vmem>>, vector<8x128xf32>
    tpu.vector_store %arg4[%c0_7, %c0_8], %15 {strides = array<i32>} : memref<8x128xf32, #tpu.memory_space<vmem>>, vector<8x128xf32>,
    return
  }
  func.func @transform_0(%arg0: i32) -> (i32, i32) {
    %c0_i32 = arith.constant 0 : i32
    %c0_i32_0 = arith.constant 0 : i32
    %c0_i32_1 = arith.constant 0 : i32
    return %c0_i32, %c0_i32_0 : i32, i32
  }
  func.func @transform_1(%arg0: i32) -> (i32, i32) {
    %c0_i32 = arith.constant 0 : i32
    %c0_i32_0 = arith.constant 0 : i32
    return %c0_i32, %arg0 : i32, i32
  }
  func.func @transform_2(%arg0: i32) -> (i32, i32) {
    %c0_i32 = arith.constant 0 : i32
    %c0_i32_0 = arith.constant 0 : i32
    return %c0_i32, %arg0 : i32, i32
  }
  func.func @transform_3(%arg0: i32) -> (i32, i32) {
    %c0_i32 = arith.constant 0 : i32
    %c0_i32_0 = arith.constant 0 : i32
    return %c0_i32, %arg0 : i32, i32
  }
}

module attributes {stable_mosaic.version = 11 : i64} {
  func.func @hidden_kernel(%arg0: i32, %arg1: memref<8x128xbf16, #tpu.memory_space<vmem>>, %arg2: memref<128x128xbf16, #tpu.memory_space<vmem>>, %arg3: memref<1x128xf32, #tpu.memory_space<vmem>>, %arg4: memref<8x128xbf16, #tpu.memory_space<vmem>>, %arg5: memref<8x128xf32, #tpu.memory_space<vmem>>) attributes {dimension_semantics = [#tpu.dimension_semantics<arbitrary>], iteration_bounds = array<i64: 1>, scalar_prefetch = 0 : i64, scratch_operands = 1 : i64, tpu.core_type = #tpu.core_type<tc>, window_params = [{transform_indices = @transform_0, window_bounds = array<i64: 8, 128>}, {transform_indices = @transform_1, window_bounds = array<i64: 128, 128>}, {pipeline_mode = #tpu.pipeline_mode<synchronous>, transform_indices = @transform_2, window_bounds = array<i64: 1, 128>}, {pipeline_mode = #tpu.pipeline_mode<synchronous>, transform_indices = @transform_3, window_bounds = array<i64: 8, 128>}]} {
    %c0_i32 = arith.constant 0 : i32
    %0 = arith.cmpi eq, %arg0, %c0_i32 : i32
    %1 = arith.extui %0 : i1 to i32
    %c0_i32_0 = arith.constant 0 : i32
    %2 = arith.cmpi ne, %1, %c0_i32_0 : i32
    scf.if %2 {
      %cst_10 = arith.constant 0.000000e+00 : f32
      %12 = vector.broadcast %cst_10 : f32 to vector<8x128xf32>
      %c0_11 = arith.constant 0 : index
      %c0_12 = arith.constant 0 : index
      %13 = vector.load %arg5[%c0_11, %c0_12] : memref<8x128xf32, #tpu.memory_space<vmem>>, vector<8x128xf32>
      tpu.vector_store %arg5[%c0_11, %c0_12], %12 {strides = array<i32>} : memref<8x128xf32, #tpu.memory_space<vmem>>, vector<8x128xf32>,
    } else {
    }
    %c0 = arith.constant 0 : index
    %c0_1 = arith.constant 0 : index
    %3 = vector.load %arg5[%c0, %c0_1] : memref<8x128xf32, #tpu.memory_space<vmem>>, vector<8x128xf32>
    %c0_2 = arith.constant 0 : index
    %c0_3 = arith.constant 0 : index
    %4 = vector.load %arg1[%c0_2, %c0_3] : memref<8x128xbf16, #tpu.memory_space<vmem>>, vector<8x128xbf16>
    %c0_4 = arith.constant 0 : index
    %c0_5 = arith.constant 0 : index
    %5 = vector.load %arg2[%c0_4, %c0_5] : memref<128x128xbf16, #tpu.memory_space<vmem>>, vector<128x128xbf16>
    %cst = arith.constant dense<0.000000e+00> : vector<8x128xf32>
    %6 = tpu.matmul %4, %5, %cst {dimension_numbers = #tpu.dot_dimension_numbers<[1], [0], [0], [1], [0, 0, 1, 1], [], []>} : vector<8x128xbf16>, vector<128x128xbf16>, vector<8x128xf32> -> vector<8x128xf32>
    %7 = arith.addf %3, %6 : vector<8x128xf32>
    %c0_6 = arith.constant 0 : index
    %c0_7 = arith.constant 0 : index
    %8 = vector.load %arg5[%c0_6, %c0_7] : memref<8x128xf32, #tpu.memory_space<vmem>>, vector<8x128xf32>
    tpu.vector_store %arg5[%c0_6, %c0_7], %7 {strides = array<i32>} : memref<8x128xf32, #tpu.memory_space<vmem>>, vector<8x128xf32>,
    %c0_i32_8 = arith.constant 0 : i32
    %9 = arith.cmpi eq, %arg0, %c0_i32_8 : i32
    %10 = arith.extui %9 : i1 to i32
    %c0_i32_9 = arith.constant 0 : i32
    %11 = arith.cmpi ne, %10, %c0_i32_9 : i32
    scf.if %11 {
      %c0_10 = arith.constant 0 : index
      %c0_11 = arith.constant 0 : index
      %12 = vector.load %arg5[%c0_10, %c0_11] : memref<8x128xf32, #tpu.memory_space<vmem>>, vector<8x128xf32>
      %c0_12 = arith.constant 0 : index
      %c0_13 = arith.constant 0 : index
      %13 = vector.load %arg3[%c0_12, %c0_13] : memref<1x128xf32, #tpu.memory_space<vmem>>, vector<1x128xf32>
      %14 = vector.broadcast %13 : vector<1x128xf32> to vector<8x128xf32>
      %15 = arith.addf %12, %14 : vector<8x128xf32>
      %16 = arith.truncf %15 : vector<8x128xf32> to vector<8x128xbf16>
      %c0_14 = arith.constant 0 : index
      %c0_15 = arith.constant 0 : index
      %17 = vector.load %arg4[%c0_14, %c0_15] : memref<8x128xbf16, #tpu.memory_space<vmem>>, vector<8x128xbf16>
      tpu.vector_store %arg4[%c0_14, %c0_15], %16 {strides = array<i32>} : memref<8x128xbf16, #tpu.memory_space<vmem>>, vector<8x128xbf16>,
    } else {
    }
    return
  }
  func.func @transform_0(%arg0: i32) -> (i32, i32) {
    %c0_i32 = arith.constant 0 : i32
    %c0_i32_0 = arith.constant 0 : i32
    return %c0_i32, %arg0 : i32, i32
  }
  func.func @transform_1(%arg0: i32) -> (i32, i32) {
    %c0_i32 = arith.constant 0 : i32
    %c0_i32_0 = arith.constant 0 : i32
    return %arg0, %c0_i32 : i32, i32
  }
  func.func @transform_2(%arg0: i32) -> (i32, i32) {
    %c0_i32 = arith.constant 0 : i32
    %c0_i32_0 = arith.constant 0 : i32
    %c0_i32_1 = arith.constant 0 : i32
    return %c0_i32, %c0_i32_0 : i32, i32
  }
  func.func @transform_3(%arg0: i32) -> (i32, i32) {
    %c0_i32 = arith.constant 0 : i32
    %c0_i32_0 = arith.constant 0 : i32
    %c0_i32_1 = arith.constant 0 : i32
    return %c0_i32, %c0_i32_0 : i32, i32
  }
}

</mosaic_0001>

<bundles_post_ra>
// kernel: _fwd.2
= control target key start
LH: loop header
LB: loop body
LE: loop exit
PB: predicated region body
PF: predicated region fallthrough
CT: control target
= control target key end

     0   :  { %8 = vsyncpa [#allocation4], 0  ;;  %s308_s0 = inlined_call_operand.vmem [shape: bf16[8,128], index: 0, kind: input, shape index: {}]   ;;  %s309_s1 = inlined_call_operand.hbm [shape: bf16[128,128], index: 1, kind: input, shape index: {}]   ;;  %s310_s2 = inlined_call_operand.hbm [shape: f32[1,128], index: 2, kind: input, shape index: {}]   ;;  %s311_s3 = inlined_call_operand.vmem [shape: bf16[8,128], index: 3, kind: output, shape index: {}]  }
   0x1   :  { %9 = vsyncpa [#allocation6], 0  ;;  %s270_s12 = smov [#allocation3]  }
   0x2   :  { %s17_s13 = sshll.u32 %s270_s12, 4  ;;  %s18_s13 = int_to_ptr.vmem [resolvable:$true] %s17_s13 }
   0x3   :  { %s234_s14 = scalar_lea.vmem %s18_s13, 1024  ;;  %p239_p1 = scmp.lt.s32.totalorder %s18_s13, %s18_s13 }
   0x4   :  { %p235_p0 = scmp.ne.s32.totalorder %s18_s13, %s234_s14  ;;  %p240_p2 = scmp.lt.s32.totalorder %s234_s14, %s234_s14 }
   0x6   :  { %p241_p3 = por %p240_p2, %p239_p1 }
   0x8   :  { %p242_p4 = pnand %p241_p3, %p235_p0 }
   0xa   :  { %245 = shalt.err (!%p242_p4)
}
   0xb   :  { %s271_s15 = smov 64   ;;  %s272_s16 = smov 4  }
   0xc   :  { %23 = dma.hbm_to_vmem [thread:$0]  %s309_s1, 1024, %s18_s13, [#allocation4], %s271_s15, %s271_s15, %s272_s16  }
   0xd   :  { %s273_s19 = smov [#allocation5]  }
   0xe   :  { %s30_s20 = sshll.u32 %s273_s19, 4  ;;  %s31_s20 = int_to_ptr.vmem [resolvable:$true] %s30_s20 }
   0xf   :  { %s254_s21 = scalar_lea.vmem %s31_s20, 16  ;;  %s258_s22 = scalar_lea.vmem %s31_s20, 32 }
  0x10   :  { %p255_p5 = scmp.ne.s32.totalorder %s31_s20, %s254_s21  ;;  %p259_p6 = scmp.lt.s32.totalorder %s31_s20, %s31_s20 }
  0x11   :  { %p260_p7 = scmp.lt.s32.totalorder %s258_s22, %s254_s21 }
  0x13   :  { %p261_p8 = por %p260_p7, %p259_p6 }
  0x15   :  { %p262_p9 = pnand %p261_p8, %p255_p5 }
  0x17   :  { %265 = shalt.err (!%p262_p9)
}
  0x18   :  { %33 = dma.hbm_to_vmem [thread:$0]  %s310_s2, 16, %s31_s20, [#allocation6]  }
  0x19   :  { %266 = dma.done.wait [#allocation4], 1024  }
  0x1a   :  { %267 = vsyncadd [#allocation4], 4294966272 }
  0x1b   :  { %268 = dma.done.wait [#allocation6], 16  }
  0x1c   :  { %269 = vsyncadd [#allocation6], 4294967280  ;;  %v274_v0 = vmov 0.0   ;;  %vm275_vm0 = vmmov 0   ;;  %v218_v1 = vld [vmem:[#allocation3 + $0x38] sm:$0xff]   ;;  %v219_v2 = vld [vmem:[#allocation3 + $0x30] sm:$0xff]  }
  0x1d   :  { %192 = vmatprep.subr.bf16.mxu0 %v274_v0  ;;  %208 = vmatprep.mubr.msk.bf16.mxu0 %vm275_vm0, %v274_v0  ;;  %v220_v3 = vld [vmem:[#allocation3 + $0x28] sm:$0xff]   ;;  %v221_v4 = vld [vmem:[#allocation3 + $0x20] sm:$0xff]   ;;  %v222_v5 = vld [vmem:[#allocation3 + $0x18] sm:$0xff]  }
  0x1e   :  { %193 = vmatpush3.bf16.msra.mxu0 %v218_v1  ;;  %v223_v6 = vld [vmem:[#allocation3 + $0x10] sm:$0xff]   ;;  %v224_v7 = vld [vmem:[#allocation3 + $0x8] sm:$0xff]   ;;  %v225_v8 = vld [vmem:[#allocation3] sm:$0xff]  }
  0x1f   :  { %194 = vmatprep.subr.bf16.mxu0 %v274_v0  ;;  %v47_v9 = vld [vmem:[%s308_s0] sm:$0xf] }
  0x20   :  { %v182_v10 = vld [vmem:[#allocation5] ss:$0 sm:$0xff] }
  0x22   :  { %195 = vmatpush3.bf16.msra.mxu0 %v219_v2 }
  0x23   :  { %196 = vmatprep.subr.bf16.mxu0 %v274_v0 }
  0x26   :  { %197 = vmatpush3.bf16.msra.mxu0 %v220_v3 }
  0x27   :  { %198 = vmatprep.subr.bf16.mxu0 %v274_v0 }
  0x2a   :  { %199 = vmatpush3.bf16.msra.mxu0 %v221_v4 }
  0x2b   :  { %200 = vmatprep.subr.bf16.mxu0 %v274_v0 }
  0x2e   :  { %201 = vmatpush3.bf16.msra.mxu0 %v222_v5 }
  0x2f   :  { %202 = vmatprep.subr.bf16.mxu0 %v274_v0 }
  0x32   :  { %203 = vmatpush3.bf16.msra.mxu0 %v223_v6 }
  0x33   :  { %204 = vmatprep.subr.bf16.mxu0 %v274_v0 }
  0x36   :  { %205 = vmatpush3.bf16.msra.mxu0 %v224_v7 }
  0x37   :  { %206 = vmatprep.subr.bf16.mxu0 %v274_v0 }
  0x3a   :  { %207 = vmatpush3.bf16.msra.mxu0 %v225_v8 }
  0x3d   :  { %209 = vmatmul.mubr.bf16.vlgmr.msra.gmra.mxu0 %v47_v9 }
  0xfd   :  { %v146_v11 = vpop.f32.mrf.mxu0 }
  0xfe   :  { %v165_v12 = vadd.f32 %v182_v10, %v146_v11 }
  0xff   :  { %v210_v13 = vpop.f32.mrf.mxu0 }
 0x100   :  { %v166_v14 = vpack.c.bf16 %v165_v12, %v165_v12 }
 0x101   :  { %v149_v15 = vpop.f32.mrf.mxu0 }
 0x102   :  { %167 = vst [vmem:[%s311_s3] sm:$0xf] %v166_v14 }
 0x103   :  { %v211_v16 = vpop.f32.mrf.mxu0 }
 0x104   :  { %172 = vsyncpa [#allocation4], 1 }
 0x105   :  { %173 = vsyncpa [#allocation6], 1 }

// kernel: _fwd.3
= control target key start
LH: loop header
LB: loop body
LE: loop exit
PB: predicated region body
PF: predicated region fallthrough
CT: control target
= control target key end

     0   :  { %v235_v1 = vmov 0.0   ;;  %vm236_vm0 = vmmov 0   ;;  %s291_s0 = inlined_call_operand.vmem [shape: bf16[8,128], index: 0, kind: input, shape index: {}]   ;;  %s292_s1 = inlined_call_operand.vmem [shape: bf16[128,128], index: 1, kind: input, shape index: {}]   ;;  %s293_s2 = inlined_call_operand.vmem [shape: f32[1,128], index: 2, kind: input, shape index: {}]   ;;  %s294_s3 = inlined_call_operand.hbm [shape: f32[8,128], index: 3, kind: output, shape index: {}]  }
   0x1   :  { %v201_v0 = vld [vmem:[%s292_s1 + $0x38] sm:$0xff]   ;;  %178 = vmatprep.subr.bf16.mxu0 %v235_v1  ;;  %v202_v2 = vld [vmem:[%s292_s1 + $0x30] sm:$0xff]   ;;  %194 = vmatprep.mubr.msk.bf16.mxu0 %vm236_vm0, %v235_v1  ;;  %v203_v3 = vld [vmem:[%s292_s1 + $0x28] sm:$0xff]  }
   0x2   :  { %179 = vmatpush3.bf16.msra.mxu0 %v201_v0 }
   0x3   :  { %180 = vmatprep.subr.bf16.mxu0 %v235_v1 }
   0x6   :  { %181 = vmatpush3.bf16.msra.mxu0 %v202_v2 }
   0x7   :  { %182 = vmatprep.subr.bf16.mxu0 %v235_v1 }
   0x8   :  { %8 = vsyncpa [#allocation3], 0  ;;  %v204_v4 = vld [vmem:[%s292_s1 + $0x20] sm:$0xff]   ;;  %v205_v5 = vld [vmem:[%s292_s1 + $0x18] sm:$0xff]  }
   0x9   :  { %v206_v6 = vld [vmem:[%s292_s1 + $0x10] sm:$0xff]   ;;  %v207_v7 = vld [vmem:[%s292_s1 + $0x8] sm:$0xff]   ;;  %v208_v8 = vld [vmem:[%s292_s1] sm:$0xff]  }
   0xa   :  { %183 = vmatpush3.bf16.msra.mxu0 %v203_v3  ;;  %v16_v9 = vld [vmem:[%s291_s0] sm:$0xf]  ;;  %s237_s0 = smov [#allocation2]  }
   0xb   :  { %184 = vmatprep.subr.bf16.mxu0 %v235_v1  ;;  %v160_v10 = vld [vmem:[%s293_s2] ss:$0 sm:$0xff]  ;;  %s152_s1 = sshll.u32 %s237_s0, 4  ;;  %s153_s1 = int_to_ptr.vmem [resolvable:$true] %s152_s1 }
   0xc   :  { %s213_s2 = scalar_lea.vmem %s153_s1, 128  ;;  %p218_p1 = scmp.lt.s32.totalorder %s153_s1, %s153_s1 }
   0xd   :  { %p214_p0 = scmp.ne.s32.totalorder %s153_s1, %s213_s2  ;;  %p219_p2 = scmp.lt.s32.totalorder %s213_s2, %s213_s2 }
   0xe   :  { %185 = vmatpush3.bf16.msra.mxu0 %v204_v4 }
   0xf   :  { %186 = vmatprep.subr.bf16.mxu0 %v235_v1  ;;  %p220_p3 = por %p219_p2, %p218_p1 }
  0x11   :  { %p221_p4 = pnand %p220_p3, %p214_p0 }
  0x12   :  { %187 = vmatpush3.bf16.msra.mxu0 %v205_v5 }
  0x13   :  { %188 = vmatprep.subr.bf16.mxu0 %v235_v1 }
  0x16   :  { %189 = vmatpush3.bf16.msra.mxu0 %v206_v6 }
  0x17   :  { %190 = vmatprep.subr.bf16.mxu0 %v235_v1 }
  0x1a   :  { %191 = vmatpush3.bf16.msra.mxu0 %v207_v7 }
  0x1b   :  { %192 = vmatprep.subr.bf16.mxu0 %v235_v1 }
  0x1e   :  { %193 = vmatpush3.bf16.msra.mxu0 %v208_v8 }
  0x21   :  { %195 = vmatmul.mubr.bf16.vlgmr.msra.gmra.mxu0 %v16_v9 }
  0xe1   :  { %v122_v11 = vpop.f32.mrf.mxu0 }
  0xe2   :  { %v123_v12 = vadd.f32 %v160_v10, %v122_v11 }
  0xe3   :  { %v196_v13 = vpop.f32.mrf.mxu0 }
  0xe4   :  { %v128_v14 = vrot.slane %v123_v12, 4 }
  0xe5   :  { %v125_v15 = vpop.f32.mrf.mxu0 }
  0xe6   :  { %v129_v16 = vmax.f32 %v123_v12, %v128_v14 }
  0xe7   :  { %v197_v17 = vpop.f32.mrf.mxu0 }
  0xe8   :  { %v130_v18 = vrot.slane %v129_v16, 2 }
  0xea   :  { %v131_v19 = vmax.f32 %v129_v16, %v130_v18 }
  0xec   :  { %v132_v20 = vrot.slane %v131_v19, 1 }
  0xee   :  { %v133_v21 = vmax.f32 %v131_v19, %v132_v20 }
  0xf0   :  { %v134_v22 = vsub.f32 %v123_v12, %v133_v21 }
  0xf2   :  { %v135_v23 = vmul.f32 1.442695, %v134_v22 }
  0xf4   :  { %209 = vpow2.f32 %v135_v23 }
 0x101   :  { %v210_v24 = vpop.eup %209 }
 0x102   :  { %v137_v25 = vrot.slane %v210_v24, 4 }
 0x104   :  { %v138_v26 = vadd.f32 %v210_v24, %v137_v25 }
 0x106   :  { %v139_v27 = vrot.slane %v138_v26, 2 }
 0x108   :  { %v140_v28 = vadd.f32 %v139_v27, %v138_v26 }
 0x10a   :  { %v141_v29 = vrot.slane %v140_v28, 1 }
 0x10c   :  { %v142_v30 = vadd.f32 %v141_v29, %v140_v28 }
 0x10e   :  { %211 = vrcp.f32 %v142_v30 }
 0x11b   :  { %v212_v31 = vpop.eup %211 }
 0x11c   :  { %v144_v32 = vmul.f32 %v212_v31, %v210_v24 }
 0x11e   :  { %145 = vst [vmem:[#allocation2] sm:$0xff] %v144_v32 }
 0x11f   :  { %224 = shalt.err (!%p221_p4)
}
 0x120   :  { %155 = dma.vmem_to_hbm [thread:$0]  %s153_s1, 128, %s294_s3, [#allocation3]  }
 0x121   :  { %233 = dma.done.wait [#allocation3], 128  }
 0x122   :  { %234 = vsyncadd [#allocation3], 4294967168 }
 0x123   :  { %159 = vsyncpa [#allocation3], 1 }

</bundles_post_ra>
